<compile_context>
chip_gen: v5e
topology: v5e:2x2
jax: 0.10.0
libtpu: 0.0.40
codegen_flags: <defaults>
</compile_context>

<pallas_src>
import jax
import jax.numpy as jnp
from jax.experimental import pallas as pl
from jax.experimental.pallas import tpu as pltpu


def _entropy_kernel(p_ref, out_ref):
    # One (TB, N) row-tile per grid step, fully resident in VMEM.
    p = p_ref[...].astype(jnp.float32)                      # (TB, N)
    m = jnp.max(p, axis=-1, keepdims=True)                  # (TB, 1)  XLU
    shifted = p - m                                         # VPU
    e = jnp.exp(shifted)                                    # EUP
    s = jnp.sum(e, axis=-1, keepdims=True)                  # (TB, 1)
    t = jnp.sum(e * shifted, axis=-1, keepdims=True)        # (TB, 1)
    # softmax = e / s ; log_softmax = shifted - log(s)
    # H = -sum(softmax * log_softmax) = log(s) - sum(e * shifted) / s
    # Exact divide on (TB, 1) values only — negligible cost, full f32 accuracy
    # (the approx EUP reciprocal previously used here cost ~1e-3 rel. error).
    ent = jnp.log(s) - t / s                                 # (TB, 1)
    out_ref[...] = ent.astype(out_ref.dtype)


def _round_up(x, m):
    return (x + m - 1) // m * m


def entropy_loss(p, *, tile_rows=None):
    """Pallas implementation of EntropyLoss.forward (row-wise softmax entropy)."""
    if p.ndim == 1:
        p = p.reshape(1, -1)
    assert p.ndim == 2
    B, N = p.shape

    itemsize = jnp.dtype(p.dtype).itemsize
    # Sublane multiple for the row-tile: 8 for 4-byte dtypes, 16 for 2-byte.
    mult = 8 if itemsize >= 4 else 16

    if tile_rows is None:
        # Double-buffered input tile budget of ~8 MiB keeps us well under the
        # scoped-VMEM limit on v5e/v6e/v7x while keeping DMAs large.
        budget_bytes = 8 * 1024 * 1024
        tb = budget_bytes // (2 * N * itemsize)
        tb = min(1024, tb)
    else:
        tb = tile_rows
    tb = max(mult, (tb // mult) * mult)            # floor to sublane multiple
    tb = min(tb, _round_up(B, mult))               # no bigger than padded batch

    # Pad batch to a tile multiple; padded rows are all-zero logits -> finite
    # entropy (log N) that we slice away below.
    B_pad = _round_up(B, tb)
    if B_pad != B:
        p = jnp.pad(p, ((0, B_pad - B), (0, 0)))

    out = pl.pallas_call(
        _entropy_kernel,
        out_shape=jax.ShapeDtypeStruct((B_pad, 1), jnp.float32),
        grid=(B_pad // tb,),
        in_specs=[pl.BlockSpec((tb, N), lambda i: (i, 0))],
        # (tb, 1) column output: only B floats total (<< B*N input bytes), so
        # the narrow writeback is noise for this memory-bound kernel.
        out_specs=pl.BlockSpec((tb, 1), lambda i: (i, 0)),
        compiler_params=pltpu.CompilerParams(
            dimension_semantics=("parallel",),
            vmem_limit_bytes=32 * 1024 * 1024,
        ),
    )(p)
    return out[:B, 0]  # (B,), matching torch Categorical.entropy()


def _reference(p):
    if p.ndim == 1:
        p = p.reshape(1, -1)
    logp = jax.nn.log_softmax(p.astype(jnp.float32), axis=-1)
    prob = jnp.exp(logp)
    return -jnp.sum(prob * logp, axis=-1)


if __name__ == "__main__":
    key = jax.random.PRNGKey(0)
    k1, k2, k3, k4 = jax.random.split(key, 4)

    # Exact f32 softmax normalization in-kernel -> tight tolerance.
    ATOL = 1e-4
    RTOL = 1e-5

    # 2-D logits: batch=8, num_classes=32 (single tile).
    p2d = jax.random.normal(k1, (8, 32), dtype=jnp.float32) * 3.0
    ent2d = jax.block_until_ready(entropy_loss(p2d))
    ref2d = _reference(p2d)
    assert ent2d.shape == (8,)
    assert jnp.allclose(ent2d, ref2d, atol=ATOL, rtol=RTOL), (ent2d, ref2d)

    # 1-D logits (module reshapes to (1, N)).
    p1d = jax.random.normal(k2, (32,), dtype=jnp.float32)
    ent1d = jax.block_until_ready(entropy_loss(p1d))
    ref1d = _reference(p1d)
    assert ent1d.shape == (1,)
    assert jnp.allclose(ent1d, ref1d, atol=ATOL, rtol=RTOL), (ent1d, ref1d)

    # Multi-tile grid + remainder rows (B=40 not a multiple of tile_rows=16).
    pmt = jax.random.normal(k3, (40, 64), dtype=jnp.float32) * 2.0
    entmt = jax.block_until_ready(entropy_loss(pmt, tile_rows=16))
    refmt = _reference(pmt)
    assert entmt.shape == (40,)
    assert jnp.allclose(entmt, refmt, atol=ATOL, rtol=RTOL), (entmt, refmt)

    # bf16 logits straight from HBM (halves read traffic); f32 math in-kernel.
    pbf = (jax.random.normal(k4, (24, 128), dtype=jnp.float32) * 2.0).astype(jnp.bfloat16)
    entbf = jax.block_until_ready(entropy_loss(pbf))
    refbf = _reference(pbf)
    assert entbf.shape == (24,)
    assert jnp.allclose(entbf, refbf, atol=ATOL, rtol=RTOL), (entbf, refbf)

    print("KERNEL_OK")
</pallas_src>

<mosaic_0001>
module attributes {stable_mosaic.version = 11 : i64} {
  func.func @_entropy_kernel(%arg0: i32, %arg1: memref<8x32xf32, #tpu.memory_space<vmem>>, %arg2: memref<8x1xf32, #tpu.memory_space<vmem>>) attributes {dimension_semantics = [#tpu.dimension_semantics<parallel>], iteration_bounds = array<i64: 1>, scalar_prefetch = 0 : i64, scratch_operands = 0 : i64, tpu.core_type = #tpu.core_type<tc>, window_params = [{transform_indices = @transform_0, window_bounds = array<i64: 8, 32>}, {transform_indices = @transform_1, window_bounds = array<i64: 8, 1>}]} {
    %c0 = arith.constant 0 : index
    %c0_0 = arith.constant 0 : index
    %0 = vector.load %arg1[%c0, %c0_0] : memref<8x32xf32, #tpu.memory_space<vmem>>, vector<8x32xf32>
    %cst = arith.constant dense<0xFF800000> : vector<8xf32>
    %1 = vector.multi_reduction <maximumf>, %0, %cst [1] : vector<8x32xf32> to vector<8xf32>
    %2 = vector.shape_cast %1 : vector<8xf32> to vector<8x1xf32>
    %3 = vector.broadcast %2 : vector<8x1xf32> to vector<8x32xf32>
    %4 = arith.subf %0, %3 : vector<8x32xf32>
    %5 = math.exp %4 : vector<8x32xf32>
    %cst_1 = arith.constant dense<0.000000e+00> : vector<8xf32>
    %6 = vector.multi_reduction <add>, %5, %cst_1 [1] : vector<8x32xf32> to vector<8xf32>
    %7 = vector.shape_cast %6 : vector<8xf32> to vector<8x1xf32>
    %8 = arith.mulf %5, %4 : vector<8x32xf32>
    %cst_2 = arith.constant dense<0.000000e+00> : vector<8xf32>
    %9 = vector.multi_reduction <add>, %8, %cst_2 [1] : vector<8x32xf32> to vector<8xf32>
    %10 = vector.shape_cast %9 : vector<8xf32> to vector<8x1xf32>
    %11 = math.log %7 : vector<8x1xf32>
    %12 = arith.divf %10, %7 : vector<8x1xf32>
    %13 = arith.subf %11, %12 : vector<8x1xf32>
    %c0_3 = arith.constant 0 : index
    %c0_4 = arith.constant 0 : index
    %14 = vector.load %arg2[%c0_3, %c0_4] : memref<8x1xf32, #tpu.memory_space<vmem>>, vector<8x1xf32>
    tpu.vector_store %arg2[%c0_3, %c0_4], %13 {strides = array<i32>} : memref<8x1xf32, #tpu.memory_space<vmem>>, vector<8x1xf32>,
    return
  }
  func.func @transform_0(%arg0: i32) -> (i32, i32) {
    %c0_i32 = arith.constant 0 : i32
    %c0_i32_0 = arith.constant 0 : i32
    return %arg0, %c0_i32 : i32, i32
  }
  func.func @transform_1(%arg0: i32) -> (i32, i32) {
    %c0_i32 = arith.constant 0 : i32
    %c0_i32_0 = arith.constant 0 : i32
    return %arg0, %c0_i32 : i32, i32
  }
}

</mosaic_0001>

<bundles_post_ra>
// kernel: tpu_custom_call.1
= control target key start
LH: loop header
LB: loop body
LE: loop exit
PB: predicated region body
PF: predicated region fallthrough
CT: control target
= control target key end

     0   :  { %6 = vsyncpa [#allocation3], 0  ;;  %s95_s9 = smov [#allocation2]   ;;  %s112_s0 = inlined_call_operand.hbm [shape: f32[8,32], index: 0, kind: input, shape index: {}]   ;;  %s113_s1 = inlined_call_operand.vmem [shape: f32[8,1], index: 1, kind: output, shape index: {}]  }
   0x1   :  { %s12_s8 = sshll.u32 %s112_s0, 4  ;;  %s14_s10 = sshll.u32 %s95_s9, 4  ;;  %s13_s8 = int_to_ptr.hbm [resolvable:$true] %s12_s8  ;;  %s15_s10 = int_to_ptr.vmem [resolvable:$true] %s14_s10 }
   0x2   :  { %17 = dma.hbm_to_vmem [thread:$0]  %s13_s8, 128, %s15_s10, [#allocation3]  }
   0x3   :  { %93 = dma.done.wait [#allocation3], 128  }
   0x4   :  { %94 = vsyncadd [#allocation3], 4294967168  ;;  %vm23_vm0 = vcmask 261120   ;;  %v22_v0 = vld [vmem:[#allocation2] sm:$0xff]  ;;  %vm55_vm5 = vcmask 7168  }
   0x5   :  { %v24_v1 = vsel %vm23_vm0, %v22_v0, -inf }
   0x6   :  { %25 = vmax.xlane.f32.xlu0 %v24_v1 }
  0x79   :  { %v26_v2 = vpop.xlane.xlu0 %25 }
  0x7a   :  { %v27_v3 = vsub.f32 %v22_v0, %v26_v2 }
  0x7c   :  { %v28_v4 = vmul.f32 1.442695, %v27_v3 }
  0x7e   :  { %63 = vpow2.f32 %v28_v4 }
  0x84   :  { %v64_v5 = vpop.eup %63 }
  0x85   :  { %v30_v6 = vsel %vm23_vm0, %v64_v5, 0.0  ;;  %v33_v7 = vmul.f32 %v64_v5, %v27_v3 }
  0x86   :  { %31 = vadd.xlane.f32.xlu0 %v30_v6 }
  0x87   :  { %v34_v8 = vsel %vm23_vm0, %v33_v7, 0.0 }
  0x88   :  { %35 = vadd.xlane.f32.xlu1 %v34_v8 }
  0xf9   :  { %v32_v9 = vpop.xlane.xlu0 %31 }
  0xfa   :  { %65 = vrcp.f32 %v32_v9  ;;  %v50_v13 = vand.u32 2147483648, %v32_v9  ;;  %v48_v15 = vand.u32 2147483647, %v32_v9  ;;  %vm44_vm2 = vweird.f32 %v32_v9 }
  0xfb   :  { %67 = vlog2.f32 %v32_v9  ;;  %v36_v20 = vpop.xlane.xlu1 %35 }
  0xfc   :  { %v51_v18 = vor.u32 1.1754944e-38, %v50_v13  ;;  %vm49_vm4 = vcmp.eq.f32.partialorder %v48_v15, 8.507059e+37 }
 0x100   :  { %v66_v10 = vpop.eup %65 }
 0x101   :  { %v40_v11 = vmul.f32 %v66_v10, %v32_v9  ;;  %vm45_vm1 = vweird.f32 %v66_v10  ;;  %v68_v17 = vpop.eup %67 }
 0x102   :  { %vm46_vm3 = vmor %vm44_vm2, %vm45_vm1  ;;  %v38_v22 = vmul.f32 0.6931472, %v68_v17 }
 0x103   :  { %v41_v12 = vsub.f32 1.0, %v40_v11 }
 0x105   :  { %v42_v14 = vmul.f32 %v66_v10, %v41_v12 }
 0x107   :  { %v43_v16 = vadd.f32 %v66_v10, %v42_v14 }
 0x109   :  { %v47_v19 = vsel %vm46_vm3, %v66_v10, %v43_v16 }
 0x10a   :  { %v52_v21 = vsel %vm49_vm4, %v51_v18, %v47_v19 }
 0x10b   :  { %v53_v23 = vmul.f32 %v52_v21, %v36_v20 }
 0x10d   :  { %v54_v24 = vsub.f32 %v38_v22, %v53_v23 }
 0x10f   :  { %56 = vst.msk [vmem:[%s113_s1] sm:$0xff] %vm55_vm5, %v54_v24 }
 0x110   :  { %61 = vsyncpa [#allocation3], 1 }

</bundles_post_ra>
